<compile_context>
chip_gen: v6e
topology: v6e:2x2x1
jax: 0.10.0
libtpu: 0.0.40
codegen_flags: <defaults>
</compile_context>

<pallas_src>
import jax
import jax.numpy as jnp
from jax.experimental import pallas as pl
from jax.experimental.pallas import tpu as pltpu

_VMEM_LIMIT = 32 * 1024 * 1024


def _round_up(x, m):
    return (x + m - 1) // m * m


# ---------------------------------------------------------------------------
# Tiling plans
# ---------------------------------------------------------------------------
def _k_plan(K):
    """Choose K-axis tiling (Kp, tk, nk). Full-K block for small K, else tile."""
    if K <= 1536:                       # whole K fits comfortably in one block
        return K, K, 1
    for tk in (512, 384, 256, 128):     # prefer an exact divisor -> no K padding
        if K % tk == 0:
            return K, tk, K // tk
    Kp = _round_up(K, 128)
    tk = min(512, Kp)
    Kp = _round_up(Kp, tk)
    return Kp, tk, Kp // tk


def _mn_plan(M, Np):
    """M tiling + N tile. Keep >=2 programs on a parallel axis when M is tiny
    (so the second v7x TensorCore is not idle on late-stage layers)."""
    Mp = _round_up(max(M, 8), 8)
    tm = min(Mp, 512)
    Mp = _round_up(Mp, tm)
    grid_m = Mp // tm
    tn = min(Np, 512 if grid_m >= 2 else 128)
    while Np % tn != 0:                 # defensive; Np is always a multiple of 128
        tn //= 2
    return Mp, tm, grid_m, tn, Np // tn


# ---------------------------------------------------------------------------
# Pallas kernels:  K-tiled (im2col @ W) with f32 accumulator,
#                  fused bias + ReLU  [+ residual],  bf16 MXU inputs.
# ---------------------------------------------------------------------------
def _mm_bias_relu_kernel(x_ref, w_ref, b_ref, o_ref, acc_ref):
    kk = pl.program_id(2)

    @pl.when(kk == 0)
    def _():
        acc_ref[...] = jnp.zeros_like(acc_ref)

    acc_ref[...] += jnp.dot(x_ref[...], w_ref[...],
                            preferred_element_type=jnp.float32)

    @pl.when(kk == pl.num_programs(2) - 1)
    def _():
        o_ref[...] = jnp.maximum(acc_ref[...] + b_ref[...], 0.0).astype(o_ref.dtype)


def _mm_bias_relu_res_kernel(x_ref, w_ref, b_ref, r_ref, o_ref, acc_ref):
    kk = pl.program_id(2)

    @pl.when(kk == 0)
    def _():
        acc_ref[...] = jnp.zeros_like(acc_ref)

    acc_ref[...] += jnp.dot(x_ref[...], w_ref[...],
                            preferred_element_type=jnp.float32)

    @pl.when(kk == pl.num_programs(2) - 1)
    def _():
        y = jnp.maximum(acc_ref[...] + b_ref[...], 0.0)
        o_ref[...] = (y + r_ref[...].astype(jnp.float32)).astype(o_ref.dtype)


def _mm2_bias_relu_kernel(x1_ref, x0_ref, w1_ref, w0_ref, b_ref, o_ref):
    # 1x1 conv on channel-concat([x1, x0]) == x1 @ w1 + x0 @ w0 (concat never built).
    acc = jnp.dot(x1_ref[...], w1_ref[...], preferred_element_type=jnp.float32)
    acc = acc + jnp.dot(x0_ref[...], w0_ref[...], preferred_element_type=jnp.float32)
    o_ref[...] = jnp.maximum(acc + b_ref[...], 0.0).astype(o_ref.dtype)


# ---------------------------------------------------------------------------
# Matmul wrappers
# ---------------------------------------------------------------------------
def matmul_bias_relu(cols, p, residual=None):
    """relu(cols @ W + b) [+ residual], K-tiled Pallas kernel, bf16 in / f32 acc."""
    M, K = cols.shape
    Kp, Np, tk, nk = p["Kp"], p["Np"], p["tk"], p["nk"]
    Mp, tm, grid_m, tn, grid_n = _mn_plan(M, Np)

    x = cols.astype(jnp.bfloat16)
    if (Mp, Kp) != (M, K):
        x = jnp.pad(x, ((0, Mp - M), (0, Kp - K)))

    in_specs = [
        pl.BlockSpec((tm, tk), lambda i, j, k: (i, k)),
        pl.BlockSpec((tk, tn), lambda i, j, k: (k, j)),
        pl.BlockSpec((1, tn), lambda i, j, k: (0, j)),
    ]
    args = [x, p["wp"], p["bp"]]
    if residual is None:
        kernel = _mm_bias_relu_kernel
    else:
        r = residual.astype(jnp.bfloat16)
        if r.shape != (Mp, Np):
            r = jnp.pad(r, ((0, Mp - r.shape[0]), (0, Np - r.shape[1])))
        in_specs.append(pl.BlockSpec((tm, tn), lambda i, j, k: (i, j)))
        args.append(r)
        kernel = _mm_bias_relu_res_kernel

    out = pl.pallas_call(
        kernel,
        out_shape=jax.ShapeDtypeStruct((Mp, Np), jnp.bfloat16),
        grid=(grid_m, grid_n, nk),
        in_specs=in_specs,
        out_specs=pl.BlockSpec((tm, tn), lambda i, j, k: (i, j)),
        scratch_shapes=[pltpu.VMEM((tm, tn), jnp.float32)],
        compiler_params=pltpu.CompilerParams(
            dimension_semantics=("parallel", "parallel", "arbitrary"),
            vmem_limit_bytes=_VMEM_LIMIT),
    )(*args)
    return out[:M, :p["N"]]


def concat_conv_bn_relu(x1_nhwc, x0_nhwc, p):
    """concat_conv: 1x1 ConvModule on torch.cat([x1, x0], dim=1), concat-free."""
    B, H, W, C1 = x1_nhwc.shape
    C0 = x0_nhwc.shape[-1]
    M = B * H * W
    Np, Ntrue = p["Np"], p["N"]
    Mp, tm, grid_m, tn, grid_n = _mn_plan(M, Np)

    x1 = x1_nhwc.reshape(M, C1).astype(jnp.bfloat16)
    x0 = x0_nhwc.reshape(M, C0).astype(jnp.bfloat16)
    if Mp != M:
        x1 = jnp.pad(x1, ((0, Mp - M), (0, 0)))
        x0 = jnp.pad(x0, ((0, Mp - M), (0, 0)))

    out = pl.pallas_call(
        _mm2_bias_relu_kernel,
        out_shape=jax.ShapeDtypeStruct((Mp, Np), jnp.bfloat16),
        grid=(grid_m, grid_n),
        in_specs=[
            pl.BlockSpec((tm, C1), lambda i, j: (i, 0)),
            pl.BlockSpec((tm, C0), lambda i, j: (i, 0)),
            pl.BlockSpec((C1, tn), lambda i, j: (0, j)),
            pl.BlockSpec((C0, tn), lambda i, j: (0, j)),
            pl.BlockSpec((1, tn), lambda i, j: (0, j)),
        ],
        out_specs=pl.BlockSpec((tm, tn), lambda i, j: (i, j)),
        compiler_params=pltpu.CompilerParams(
            dimension_semantics=("parallel", "parallel"),
            vmem_limit_bytes=_VMEM_LIMIT),
    )(x1, x0, p["w1p"], p["w0p"], p["bp"])
    return out[:M, :Ntrue].reshape(B, H, W, Ntrue)


# ---------------------------------------------------------------------------
# ConvModule = Conv2d(no bias) + BN(folded) + ReLU   (im2col glue + Pallas matmul)
# ---------------------------------------------------------------------------
def conv_bn_relu(x_nhwc, p, residual=None):
    k, s, pad = p["ksize"], p["stride"], p["pad"]
    B, H, W, C = x_nhwc.shape
    if k == 1 and s == 1 and pad == 0:
        Ho, Wo = H, W
        cols = x_nhwc.reshape(B * H * W, C)
    else:
        xp = jnp.pad(x_nhwc, ((0, 0), (pad, pad), (pad, pad), (0, 0)))
        Ho = (H + 2 * pad - k) // s + 1
        Wo = (W + 2 * pad - k) // s + 1
        patches = []
        for di in range(k):
            for dj in range(k):
                patches.append(xp[:, di:di + s * Ho:s, dj:dj + s * Wo:s, :])
        cols = jnp.concatenate(patches, axis=-1).reshape(B * Ho * Wo, k * k * C)

    res2d = None if residual is None else residual.reshape(B * Ho * Wo, -1)
    y = matmul_bias_relu(cols, p, residual=res2d)
    return y.reshape(B, Ho, Wo, p["N"])


# ---------------------------------------------------------------------------
# Parameter construction (kaiming-normal conv, constant-init BN folded in,
# weights pre-padded / pre-cast to bf16 tile shapes at build time)
# ---------------------------------------------------------------------------
def _raw_conv_weights(key, cin, cout, k):
    fan_out = cout * k * k
    std = (2.0 / fan_out) ** 0.5
    w = std * jax.random.normal(key, (cout, cin, k, k), jnp.float32)
    # BN: gamma=1, beta=0, running_mean=0, running_var=1, eps=1e-5 -> fold into conv.
    gamma = jnp.ones((cout,), jnp.float32)
    beta = jnp.zeros((cout,), jnp.float32)
    mean = jnp.zeros((cout,), jnp.float32)
    var = jnp.ones((cout,), jnp.float32)
    eps = 1e-5
    scale = gamma / jnp.sqrt(var + eps)
    w_f = w * scale[:, None, None, None]
    b_f = beta - mean * scale
    # im2col column order is (kh, kw, cin) -> weight matrix (kh*kw*cin, cout)
    wmat = jnp.transpose(w_f, (2, 3, 1, 0)).reshape(k * k * cin, cout)
    return wmat, b_f


def _finalize_conv(wmat, bvec, k, stride, pad):
    K, N = wmat.shape
    Kp, tk, nk = _k_plan(K)
    Np = _round_up(N, 128)
    wp = jnp.zeros((Kp, Np), jnp.bfloat16).at[:K, :N].set(wmat.astype(jnp.bfloat16))
    bp = jnp.zeros((1, Np), jnp.float32).at[0, :N].set(bvec)
    return dict(wp=wp, bp=bp, ksize=k, stride=stride, pad=pad,
                K=K, N=N, Kp=Kp, Np=Np, tk=tk, nk=nk)


def make_conv_module(key, cin, cout, k, stride=1, pad=0):
    wmat, b = _raw_conv_weights(key, cin, cout, k)
    return _finalize_conv(wmat, b, k, stride, pad)


def make_fused_split(key0, key1, cin, n0, n1):
    # split_conv0 and split_conv1 share the same input -> one matmul, wider N.
    w0, b0 = _raw_conv_weights(key0, cin, n0, 1)
    w1, b1 = _raw_conv_weights(key1, cin, n1, 1)
    p = _finalize_conv(jnp.concatenate([w0, w1], axis=1),
                       jnp.concatenate([b0, b1]), 1, 1, 0)
    p["n0"], p["n1"] = n0, n1
    return p


def make_concat_module(key, c1, c0, cout):
    # concat_conv weight split by input source: rows [:c1] act on x1, [c1:] on x0.
    wmat, b = _raw_conv_weights(key, c1 + c0, cout, 1)
    Np = _round_up(cout, 128)
    w1p = jnp.zeros((c1, Np), jnp.bfloat16).at[:, :cout].set(
        wmat[:c1].astype(jnp.bfloat16))
    w0p = jnp.zeros((c0, Np), jnp.bfloat16).at[:, :cout].set(
        wmat[c1:].astype(jnp.bfloat16))
    bp = jnp.zeros((1, Np), jnp.float32).at[0, :cout].set(b)
    return dict(w1p=w1p, w0p=w0p, bp=bp, N=cout, Np=Np, c1=c1, c0=c0)


def build_cspdarknet_params(key):
    keys = iter(jax.random.split(key, 512))

    def conv(cin, cout, k, stride=1, pad=0):
        return make_conv_module(next(keys), cin, cout, k, stride, pad)

    channels = (32, 64, 128, 256, 512, 1024)
    layers = (1, 2, 8, 8, 4)

    params = {"conv0": conv(3, 32, 3, 1, 1), "stages": []}
    for si in range(5):
        cin, cout, nb = channels[si], channels[si + 1], layers[si]
        first = (si == 0)
        st = {"downsample": conv(cin, cout, 3, 2, 1)}
        if first:
            st["split"] = make_fused_split(next(keys), next(keys), cout, cout, cout)
            st["resblocks"] = [dict(c1=conv(cout, cout // 2, 1),
                                    c2=conv(cout // 2, cout, 3, 1, 1))]
            st["blocks_final"] = conv(cout, cout, 1)
            st["concat"] = make_concat_module(next(keys), cout, cout, cout)
        else:
            half = cout // 2
            st["split"] = make_fused_split(next(keys), next(keys), cout, half, half)
            st["resblocks"] = [dict(c1=conv(half, half, 1),
                                    c2=conv(half, half, 3, 1, 1))
                               for _ in range(nb)]
            st["blocks_final"] = conv(half, half, 1)
            st["concat"] = make_concat_module(next(keys), half, half, cout)
        params["stages"].append(st)
    return params


# ---------------------------------------------------------------------------
# Forward pass (matches CSPDarknet.forward semantics)
# ---------------------------------------------------------------------------
def csp_block_forward(p, x):
    x = conv_bn_relu(x, p["downsample"])
    xs = conv_bn_relu(x, p["split"])            # fused split_conv0 + split_conv1
    n0 = p["split"]["n0"]
    x0 = xs[..., :n0]
    x1 = xs[..., n0:]
    for rb in p["resblocks"]:
        h = conv_bn_relu(x1, rb["c1"])
        # ResBlock: x1 + relu(bn(conv2(h))); residual add fused into the 3x3 kernel.
        x1 = conv_bn_relu(h, rb["c2"], residual=x1)
    x1 = conv_bn_relu(x1, p["blocks_final"])
    # torch.cat([x1, x0], dim=1) + concat_conv, without materializing the concat.
    return concat_conv_bn_relu(x1, x0, p["concat"])


def cspdarknet_forward(params, x_nchw):
    # layout: input NCHW -> NHWC/bf16 internally -> outputs returned as NCHW f32.
    x = jnp.transpose(x_nchw, (0, 2, 3, 1)).astype(jnp.bfloat16)
    x = conv_bn_relu(x, params["conv0"])
    x = csp_block_forward(params["stages"][0], x)
    x = csp_block_forward(params["stages"][1], x)
    out3 = csp_block_forward(params["stages"][2], x)
    out4 = csp_block_forward(params["stages"][3], out3)
    out5 = csp_block_forward(params["stages"][4], out4)
    to_nchw = lambda t: jnp.transpose(t, (0, 3, 1, 2)).astype(jnp.float32)
    return [to_nchw(out3), to_nchw(out4), to_nchw(out5)]


if __name__ == "__main__":
    key = jax.random.PRNGKey(0)
    pkey, xkey = jax.random.split(key)
    params = build_cspdarknet_params(pkey)

    # Small input consistent with the module: NCHW, 3 input channels, /32 downsampling.
    x = jax.random.normal(xkey, (2, 3, 32, 32), jnp.float32)

    outs = cspdarknet_forward(params, x)
    outs = jax.block_until_ready(outs)

    assert outs[0].shape == (2, 256, 4, 4), outs[0].shape
    assert outs[1].shape == (2, 512, 2, 2), outs[1].shape
    assert outs[2].shape == (2, 1024, 1, 1), outs[2].shape
    assert all(bool(jnp.all(jnp.isfinite(o))) for o in outs)
    print("KERNEL_OK")
</pallas_src>

<mosaic_0001>
module attributes {stable_mosaic.version = 11 : i64} {
  func.func @_mm_bias_relu_kernel(%arg0: i32, %arg1: i32, %arg2: i32, %arg3: memref<512x27xbf16, #tpu.memory_space<vmem>>, %arg4: memref<27x128xbf16, #tpu.memory_space<vmem>>, %arg5: memref<1x128xf32, #tpu.memory_space<vmem>>, %arg6: memref<512x128xbf16, #tpu.memory_space<vmem>>, %arg7: memref<512x128xf32, #tpu.memory_space<vmem>>) attributes {dimension_semantics = [#tpu.dimension_semantics<parallel>, #tpu.dimension_semantics<parallel>, #tpu.dimension_semantics<arbitrary>], iteration_bounds = array<i64: 4, 1, 1>, scalar_prefetch = 0 : i64, scratch_operands = 1 : i64, tpu.core_type = #tpu.core_type<tc>, window_params = [{transform_indices = @transform_0, window_bounds = array<i64: 512, 27>}, {transform_indices = @transform_1, window_bounds = array<i64: 27, 128>}, {transform_indices = @transform_2, window_bounds = array<i64: 1, 128>}, {transform_indices = @transform_3, window_bounds = array<i64: 512, 128>}]} {
    %c0_i32 = arith.constant 0 : i32
    %0 = arith.cmpi eq, %arg2, %c0_i32 : i32
    %1 = arith.extui %0 : i1 to i32
    %c0_i32_0 = arith.constant 0 : i32
    %2 = arith.cmpi ne, %1, %c0_i32_0 : i32
    scf.if %2 {
      %cst_10 = arith.constant 0.000000e+00 : f32
      %12 = vector.broadcast %cst_10 : f32 to vector<512x128xf32>
      %c0_11 = arith.constant 0 : index
      %c0_12 = arith.constant 0 : index
      %13 = vector.load %arg7[%c0_11, %c0_12] : memref<512x128xf32, #tpu.memory_space<vmem>>, vector<512x128xf32>
      tpu.vector_store %arg7[%c0_11, %c0_12], %12 {strides = array<i32>} : memref<512x128xf32, #tpu.memory_space<vmem>>, vector<512x128xf32>,
    } else {
    }
    %c0 = arith.constant 0 : index
    %c0_1 = arith.constant 0 : index
    %3 = vector.load %arg7[%c0, %c0_1] : memref<512x128xf32, #tpu.memory_space<vmem>>, vector<512x128xf32>
    %c0_2 = arith.constant 0 : index
    %c0_3 = arith.constant 0 : index
    %4 = vector.load %arg3[%c0_2, %c0_3] : memref<512x27xbf16, #tpu.memory_space<vmem>>, vector<512x27xbf16>
    %c0_4 = arith.constant 0 : index
    %c0_5 = arith.constant 0 : index
    %5 = vector.load %arg4[%c0_4, %c0_5] : memref<27x128xbf16, #tpu.memory_space<vmem>>, vector<27x128xbf16>
    %cst = arith.constant dense<0.000000e+00> : vector<512x128xf32>
    %6 = tpu.matmul %4, %5, %cst {dimension_numbers = #tpu.dot_dimension_numbers<[1], [0], [0], [1], [0, 0, 1, 1], [], []>} : vector<512x27xbf16>, vector<27x128xbf16>, vector<512x128xf32> -> vector<512x128xf32>
    %7 = arith.addf %3, %6 : vector<512x128xf32>
    %c0_6 = arith.constant 0 : index
    %c0_7 = arith.constant 0 : index
    %8 = vector.load %arg7[%c0_6, %c0_7] : memref<512x128xf32, #tpu.memory_space<vmem>>, vector<512x128xf32>
    tpu.vector_store %arg7[%c0_6, %c0_7], %7 {strides = array<i32>} : memref<512x128xf32, #tpu.memory_space<vmem>>, vector<512x128xf32>,
    %c0_i32_8 = arith.constant 0 : i32
    %9 = arith.cmpi eq, %arg2, %c0_i32_8 : i32
    %10 = arith.extui %9 : i1 to i32
    %c0_i32_9 = arith.constant 0 : i32
    %11 = arith.cmpi ne, %10, %c0_i32_9 : i32
    scf.if %11 {
      %c0_10 = arith.constant 0 : index
      %c0_11 = arith.constant 0 : index
      %12 = vector.load %arg7[%c0_10, %c0_11] : memref<512x128xf32, #tpu.memory_space<vmem>>, vector<512x128xf32>
      %c0_12 = arith.constant 0 : index
      %c0_13 = arith.constant 0 : index
      %13 = vector.load %arg5[%c0_12, %c0_13] : memref<1x128xf32, #tpu.memory_space<vmem>>, vector<1x128xf32>
      %14 = vector.broadcast %13 : vector<1x128xf32> to vector<512x128xf32>
      %15 = arith.addf %12, %14 : vector<512x128xf32>
      %cst_14 = arith.constant 0.000000e+00 : f32
      %16 = vector.broadcast %cst_14 : f32 to vector<512x128xf32>
      %17 = arith.maximumf %15, %16 : vector<512x128xf32>
      %18 = arith.truncf %17 : vector<512x128xf32> to vector<512x128xbf16>
      %c0_15 = arith.constant 0 : index
      %c0_16 = arith.constant 0 : index
      %19 = vector.load %arg6[%c0_15, %c0_16] : memref<512x128xbf16, #tpu.memory_space<vmem>>, vector<512x128xbf16>
      tpu.vector_store %arg6[%c0_15, %c0_16], %18 {strides = array<i32>} : memref<512x128xbf16, #tpu.memory_space<vmem>>, vector<512x128xbf16>,
    } else {
    }
    return
  }
  func.func @transform_0(%arg0: i32, %arg1: i32, %arg2: i32) -> (i32, i32) {
    %c0_i32 = arith.constant 0 : i32
    return %arg0, %arg2 : i32, i32
  }
  func.func @transform_1(%arg0: i32, %arg1: i32, %arg2: i32) -> (i32, i32) {
    %c0_i32 = arith.constant 0 : i32
    return %arg2, %arg1 : i32, i32
  }
  func.func @transform_2(%arg0: i32, %arg1: i32, %arg2: i32) -> (i32, i32) {
    %c0_i32 = arith.constant 0 : i32
    %c0_i32_0 = arith.constant 0 : i32
    return %c0_i32, %arg1 : i32, i32
  }
  func.func @transform_3(%arg0: i32, %arg1: i32, %arg2: i32) -> (i32, i32) {
    %c0_i32 = arith.constant 0 : i32
    return %arg0, %arg1 : i32, i32
  }
}

</mosaic_0001>

<bundles_post_ra>
// kernel: tpu_custom_call.1
= control target key start
LH: loop header
LB: loop body
LE: loop exit
PB: predicated region body
PF: predicated region fallthrough
CT: control target
= control target key end

     0   :  { %8 = vsyncpa [#allocation4], 0  ;;  %s2784_s0 = inlined_call_operand.vmem [shape: bf16[2048,27], index: 0, kind: input, shape index: {}]   ;;  %s2785_s1 = inlined_call_operand.vmem [shape: bf16[27,128], index: 1, kind: input, shape index: {}]   ;;  %s2786_s2 = inlined_call_operand.vmem [shape: f32[1,128], index: 2, kind: input, shape index: {}]   ;;  %s2787_s3 = inlined_call_operand.hbm [shape: bf16[2048,128], index: 3, kind: output, shape index: {}]  }
   0x1   :  { %10 = vsyncpa [#allocation4 + $0x1], 0  ;;  %s2491_s12 = smov 0   ;;  %s2493_s13 = smov 0  }
   0x2   :  { %s2495_s14 = smov 0   ;;  %s2497_s15 = smov 0  }
   0x3   :  { %s2499_s16 = smov 0   ;;  %s2501_s17 = smov 0  }
   0x4 LB: > { %s1789_s18 = sadd.s32 4294967295, %s2465_s17   ;;  %s1790_s19 = sadd.s32 4294967294, %s2465_s17   ;;  %s2465_s17 = sphi %s2501_s17, %s16_s17   ;;  %s2461_s16 = sphi %s2499_s16, %s2794_s16   ;;  %s2457_s15 = sphi %s2497_s15, %s2793_s15   ;;  %s2453_s14 = sphi %s2495_s14, %s2792_s14   ;;  %s2449_s13 = sphi %s2493_s13, %s2791_s13   ;;  %s2445_s12 = sphi %s2491_s12, %s2790_s12  }
   0x5   : > { %s35_s20 = sadd.s32 1, %s2461_s16  ;;  %s126_s21 = sadd.s32 1, %s2453_s14 }
   0x6   : > { %p37_p0 = scmp.ge.s32.totalorder %s35_s20, 4  ;;  %p136_p1 = scmp.ne.s32.totalorder %s2453_s14, %s2449_s13 }
   0x7   : > { %p137_p2 = scmp.eq.s32.totalorder %s1789_s18, 3  ;;  %p142_p3 = scmp.ne.s32.totalorder %s2449_s13, %s2445_s12 }
   0x8   : > { %s2796_s20 = smov (%p37_p0, %s35_s20), 0  ;;  %p143_p5 = scmp.eq.s32.totalorder %s1790_s19, 3 }
   0x9   : > { %p2531_p4 = por %p137_p2, %p136_p1  ;;  %s121_s23 = ssub.s32 %s2461_s16, %s2796_s20 }
   0xa   : > { %p1795_p6 = scmp.ge.s32.totalorder %s2465_s17, 1  ;;  %p124_p7 = scmp.eq.s32.totalorder %s121_s23, 0 }
   0xb   : > { %p2538_p8 = por %p143_p5, %p142_p3  ;;  %p191_p9 = scmp.lt.s32.totalorder %s2465_s17, 5 }
   0xc   : > { %s2544_s25 = scalar_select %p124_p7, %s2453_s14, %s126_s21  }
   0xd   : > { %p192_p10 = pnand %p1795_p6, %p191_p9 }
   0xe   : > { %s1797_s28 = sshll.u32 (!%p192_p10), %s2457_s15, 6  ;;  %s226_s10 = sand.u32 (!%p192_p10), 1, %s2449_s13  }
   0xf   : > { %195 = sbr.rel (%p192_p10) target bundleno = 308 (0x134), region = 32  ;;  %p230_p11 = scmp.lt.s32.totalorder (!%p192_p10), %s1797_s28, 255 }
  0x10   : > { %s1796_s11 = sshll.u32 (!%p192_p10), %s226_s10, 8  ;;  %s1999_s19 = sshll.u32 (!%p192_p10), %s2457_s15, 12 }
  0x11   : > { %s2640_s18 = scalar_lea.vmem (!%p192_p10), [#allocation3], %s1796_s11  ;;  %s2729_s27 = scalar_lea.hbm (!%p192_p10), %s2787_s3, %s1999_s19 }
  0x12   : > { %s1681_s21 = sshll.u32 (!%p192_p10), %s2640_s18, 4  ;;  %s2739_s15 = scalar_lea.sflag (!%p192_p10), [#allocation4], %s226_s10  ;;  %s2731_s21 = int_to_ptr.vmem [resolvable:$true] %s1681_s21 }
  0x13   : > { %s2468_s29 = smov (!%p192_p10), [#allocation3]  }
  0x14   : > { %v2355_v0 = vld [vmem:[%s2785_s1 + $0x8] sm:$0x3f]   ;;  %vm720_vm0 = vcmask 1044480   ;;  %vm721_vm1 = vcmask 1045504   ;;  %v2467_v1 = vmov 65535   ;;  %v2356_v5 = vld [vmem:[%s2785_s1] sm:$0xff]  }
  0x15   : > { %v722_v2 = vsel %vm720_vm0, 4294967295, %v2467_v1  ;;  %s2798_s28 = smov (!%p230_p11, %s1797_s28), 255  ;;  %vm623_vm2 = vcmask 220160   ;;  %v2625_v38 = vld [vmem:[%s2786_s2] ss:$0 sm:$0xff]  ;;  %s2393_s30 = sshll.u32 %s2468_s29, 4  ;;  %s2394_s30 = int_to_ptr.vmem [resolvable:$false] %s2393_s30 }
  0x16   : > { %v723_v3 = vsel %vm721_vm1, %v722_v2, 0  ;;  %s1798_s4 = sshll.u32 %s2798_s28, 2  ;;  %s2389_s28 = scalar_lea.vmem %s2731_s21, 4096 }
  0x17   : > { %v725_v4 = vand.u32 %v2355_v0, %v723_v3  ;;  %s2556_s7 = scalar_lea.vmem %s2784_s0, %s1798_s4  ;;  %p2390_p12 = scmp.ne.s32.totalorder %s2731_s21, %s2389_s28 }
  0x18   : > { %v2357_v6 = vld [vmem:[%s2556_s7] sm:$0xff]   ;;  %v2359_v8 = vld [vmem:[%s2556_s7 + $0x8] sm:$0xff]   ;;  %v2361_v10 = vld [vmem:[%s2556_s7 + $0x10] sm:$0xff]   ;;  %s2395_s4 = scalar_lea.vmem %s2394_s30, 8192  ;;  %p2396_p1 = scmp.lt.s32.totalorder %s2731_s21, %s2394_s30 }
  0x19   : > { %2225 = vmatprep.subr.bf16.mxu0 %v725_v4  ;;  %2293 = vmatprep.subr.bf16.mxu1 %v725_v4  ;;  %v2358_v7 = vld [vmem:[%s2556_s7 + $0x80] sm:$0xff]   ;;  %v2360_v9 = vld [vmem:[%s2556_s7 + $0x88] sm:$0xff]   ;;  %v2362_v11 = vld [vmem:[%s2556_s7 + $0x90] sm:$0xff]   ;;  %p2391_p13 = pnand %p2390_p12, %p2531_p4  ;;  %p2397_p2 = scmp.lt.s32.totalorder %s2395_s4, %s2389_s28 }
  0x1a   : > { %2226 = vmatpush3.bf16.msra.mxu0 %v725_v4  ;;  %2295 = vmatpush3.bf16.msra.mxu1 %v725_v4  ;;  %v2363_v12 = vld [vmem:[%s2556_s7 + $0x18] sm:$0xff]   ;;  %v2365_v14 = vld [vmem:[%s2556_s7 + $0x20] sm:$0xff]   ;;  %v2367_v16 = vld [vmem:[%s2556_s7 + $0x28] sm:$0xff]  }
  0x1b   : > { %2227 = vmatprep.subr.bf16.mxu0 %v2356_v5  ;;  %2294 = vmatprep.subr.bf16.mxu1 %v2356_v5  ;;  %v2364_v13 = vld [vmem:[%s2556_s7 + $0x98] sm:$0xff]   ;;  %v2366_v15 = vld [vmem:[%s2556_s7 + $0xa0] sm:$0xff]   ;;  %v2368_v17 = vld [vmem:[%s2556_s7 + $0xa8] sm:$0xff]   ;;  %p2392_p0 = pneg %p2391_p13  ;;  %p2398_p3 = por %p2397_p2, %p2396_p1 }
  0x1c   : > { %2229 = vmatprep.mubr.msk.bf16.mxu0 %vm623_vm2, %v2357_v6  ;;  %2261 = vmatprep.mubr.msk.bf16.mxu1 %vm623_vm2, %v2358_v7  ;;  %v2369_v18 = vld [vmem:[%s2556_s7 + $0x30] sm:$0xff]   ;;  %v2371_v20 = vld [vmem:[%s2556_s7 + $0x38] sm:$0xff]   ;;  %v2373_v22 = vld [vmem:[%s2556_s7 + $0x40] sm:$0xff]  }
  0x1d   : > { %v2370_v19 = vld [vmem:[%s2556_s7 + $0xb0] sm:$0xff]   ;;  %v2372_v21 = vld [vmem:[%s2556_s7 + $0xb8] sm:$0xff]   ;;  %v2374_v23 = vld [vmem:[%s2556_s7 + $0xc0] sm:$0xff]   ;;  %p2399_p5 = pnand %p2398_p3, %p2392_p0 }
  0x1e   : > { %2228 = vmatpush3.bf16.msra.mxu0 %v2356_v5  ;;  %2296 = vmatpush3.bf16.msra.mxu1 %v2356_v5  ;;  %v2375_v24 = vld [vmem:[%s2556_s7 + $0x48] sm:$0xff]   ;;  %v2377_v26 = vld [vmem:[%s2556_s7 + $0x50] sm:$0xff]   ;;  %v2379_v28 = vld [vmem:[%s2556_s7 + $0x58] sm:$0xff]  }
  0x1f   : > { %v2376_v25 = vld [vmem:[%s2556_s7 + $0xc8] sm:$0xff]   ;;  %v2378_v27 = vld [vmem:[%s2556_s7 + $0xd0] sm:$0xff]   ;;  %v2380_v29 = vld [vmem:[%s2556_s7 + $0xd8] sm:$0xff]  }
  0x20   : > { %v2381_v30 = vld [vmem:[%s2556_s7 + $0x60] sm:$0xff]   ;;  %v2383_v32 = vld [vmem:[%s2556_s7 + $0x68] sm:$0xff]   ;;  %v2385_v34 = vld [vmem:[%s2556_s7 + $0x70] sm:$0xff]  }
  0x21   : > { %2230 = vmatmul.mubr.msk.bf16.vlgmr.msra.gmra.mxu0 %vm623_vm2, %v2359_v8  ;;  %2262 = vmatmul.mubr.msk.bf16.vlgmr.msra.gmra.mxu1 %vm623_vm2, %v2360_v9  ;;  %v2382_v31 = vld [vmem:[%s2556_s7 + $0xe0] sm:$0xff]   ;;  %v2384_v33 = vld [vmem:[%s2556_s7 + $0xe8] sm:$0xff]   ;;  %v2386_v35 = vld [vmem:[%s2556_s7 + $0xf0] sm:$0xff]  }
  0x22   : > { %2233 = vmatprep.mubr.msk.bf16.mxu0 %vm623_vm2, %v2361_v10  ;;  %2265 = vmatprep.mubr.msk.bf16.mxu1 %vm623_vm2, %v2362_v11  ;;  %v2387_v36 = vld [vmem:[%s2556_s7 + $0x78] sm:$0xff]  }
  0x23   : > { %v2388_v37 = vld [vmem:[%s2556_s7 + $0xf8] sm:$0xff]  }
  0x29   : > { %2234 = vmatmul.mubr.msk.bf16.gmra.mxu0 %vm623_vm2, %v2363_v12  ;;  %2266 = vmatmul.mubr.msk.bf16.gmra.mxu1 %vm623_vm2, %v2364_v13 }
  0x2a   : > { %2237 = vmatprep.mubr.msk.bf16.mxu0 %vm623_vm2, %v2365_v14  ;;  %2269 = vmatprep.mubr.msk.bf16.mxu1 %vm623_vm2, %v2366_v15 }
  0x31   : > { %2238 = vmatmul.mubr.msk.bf16.gmra.mxu0 %vm623_vm2, %v2367_v16  ;;  %2270 = vmatmul.mubr.msk.bf16.gmra.mxu1 %vm623_vm2, %v2368_v17 }
  0x32   : > { %2241 = vmatprep.mubr.msk.bf16.mxu0 %vm623_vm2, %v2369_v18  ;;  %2273 = vmatprep.mubr.msk.bf16.mxu1 %vm623_vm2, %v2370_v19 }
  0x39   : > { %2242 = vmatmul.mubr.msk.bf16.gmra.mxu0 %vm623_vm2, %v2371_v20  ;;  %2274 = vmatmul.mubr.msk.bf16.gmra.mxu1 %vm623_vm2, %v2372_v21 }
  0x3a   : > { %2245 = vmatprep.mubr.msk.bf16.mxu0 %vm623_vm2, %v2373_v22  ;;  %2277 = vmatprep.mubr.msk.bf16.mxu1 %vm623_vm2, %v2374_v23 }
  0x41   : > { %2246 = vmatmul.mubr.msk.bf16.gmra.mxu0 %vm623_vm2, %v2375_v24  ;;  %2278 = vmatmul.mubr.msk.bf16.gmra.mxu1 %vm623_vm2, %v2376_v25 }
  0x42   : > { %2249 = vmatprep.mubr.msk.bf16.mxu0 %vm623_vm2, %v2377_v26  ;;  %2281 = vmatprep.mubr.msk.bf16.mxu1 %vm623_vm2, %v2378_v27 }
  0x49   : > { %2250 = vmatmul.mubr.msk.bf16.gmra.mxu0 %vm623_vm2, %v2379_v28  ;;  %2282 = vmatmul.mubr.msk.bf16.gmra.mxu1 %vm623_vm2, %v2380_v29 }
  0x4a   : > { %2253 = vmatprep.mubr.msk.bf16.mxu0 %vm623_vm2, %v2381_v30  ;;  %2285 = vmatprep.mubr.msk.bf16.mxu1 %vm623_vm2, %v2382_v31 }
  0x51   : > { %2254 = vmatmul.mubr.msk.bf16.gmra.mxu0 %vm623_vm2, %v2383_v32  ;;  %2286 = vmatmul.mubr.msk.bf16.gmra.mxu1 %vm623_vm2, %v2384_v33 }
  0x52   : > { %2257 = vmatprep.mubr.msk.bf16.mxu0 %vm623_vm2, %v2385_v34  ;;  %2289 = vmatprep.mubr.msk.bf16.mxu1 %vm623_vm2, %v2386_v35 }
  0x59   : > { %2258 = vmatmul.mubr.msk.bf16.gmra.mxu0 %vm623_vm2, %v2387_v36  ;;  %2290 = vmatmul.mubr.msk.bf16.gmra.mxu1 %vm623_vm2, %v2388_v37 }
  0xe1   : > { %v2231_v39 = vpop.f32.mrf.mxu0  ;;  %v2263_v40 = vpop.f32.mrf.mxu1 }
  0xe2   : > { %v1220_v41 = vadd.f32 %v2231_v39, %v2625_v38  ;;  %v1252_v42 = vadd.f32 %v2263_v40, %v2625_v38 }
  0xe3   : > { %v761_v43 = vpop.f32.mrf.mxu0  ;;  %v889_v44 = vpop.f32.mrf.mxu1 }
  0xe4   : > { %v1218_v45 = vadd.f32 %v2625_v38, %v761_v43  ;;  %v1250_v46 = vadd.f32 %v2625_v38, %v889_v44  ;;  %v1284_v51 = vmax.f32 %v1220_v41, 0.0  ;;  %v1316_v52 = vmax.f32 %v1252_v42, 0.0 }
  0xe5   : > { %v2232_v47 = vpop.f32.mrf.mxu0  ;;  %v2264_v48 = vpop.f32.mrf.mxu1 }
  0xe6   : > { %v1221_v49 = vadd.f32 %v2232_v47, %v2625_v38  ;;  %v1253_v50 = vadd.f32 %v2264_v48, %v2625_v38  ;;  %v1282_v59 = vmax.f32 %v1218_v45, 0.0  ;;  %v1314_v60 = vmax.f32 %v1250_v46, 0.0 }
  0xe7   : > { %v764_v53 = vpop.f32.mrf.mxu0  ;;  %v892_v54 = vpop.f32.mrf.mxu1 }
  0xe8   : > { %v1285_v55 = vmax.f32 %v1221_v49, 0.0  ;;  %v1317_v56 = vmax.f32 %v1253_v50, 0.0  ;;  %v1219_v57 = vadd.f32 %v2625_v38, %v764_v53  ;;  %v1251_v58 = vadd.f32 %v2625_v38, %v892_v54 }
  0xe9   : > { %v2235_v61 = vpop.f32.mrf.mxu0  ;;  %v2267_v62 = vpop.f32.mrf.mxu1 }
  0xea   : > { %v2008_v63 = vpack.c.bf16 %v1285_v55, %v1284_v51  ;;  %v2088_v0 = vpack.c.bf16 %v1317_v56, %v1316_v52  ;;  %v1283_v1 = vmax.f32 %v1219_v57, 0.0  ;;  %v1315_v2 = vmax.f32 %v1251_v58, 0.0 }
  0xeb   : > { %v1224_v3 = vadd.f32 %v2235_v61, %v2625_v38  ;;  %v1256_v4 = vadd.f32 %v2267_v62, %v2625_v38  ;;  %v777_v5 = vpop.f32.mrf.mxu0  ;;  %v905_v6 = vpop.f32.mrf.mxu1 }
  0xec   : > { %2160 = vst [vmem:[%s2640_s18 + $0x8] sm:$0xff] %v2008_v63   ;;  %2176 = vst [vmem:[%s2640_s18 + $0x88] sm:$0xff] %v2088_v0   ;;  %v2003_v7 = vpack.c.bf16 %v1283_v1, %v1282_v59  ;;  %v2083_v8 = vpack.c.bf16 %v1315_v2, %v1314_v60  ;;  %v1222_v9 = vadd.f32 %v2625_v38, %v777_v5 }
  0xed   : > { %v1254_v10 = vadd.f32 %v2625_v38, %v905_v6  ;;  %v2236_v11 = vpop.f32.mrf.mxu0  ;;  %v2268_v12 = vpop.f32.mrf.mxu1  ;;  %v1288_v15 = vmax.f32 %v1224_v3, 0.0  ;;  %v1320_v16 = vmax.f32 %v1256_v4, 0.0 }
  0xee   : > { %2004 = vst [vmem:[%s2640_s18] sm:$0xff] %v2003_v7   ;;  %2175 = vst [vmem:[%s2640_s18 + $0x80] sm:$0xff] %v2083_v8   ;;  %v1225_v13 = vadd.f32 %v2236_v11, %v2625_v38  ;;  %v1257_v14 = vadd.f32 %v2268_v12, %v2625_v38  ;;  %v1286_v23 = vmax.f32 %v1222_v9, 0.0 }
  0xef   : > { %v780_v17 = vpop.f32.mrf.mxu0  ;;  %v908_v18 = vpop.f32.mrf.mxu1  ;;  %v1318_v24 = vmax.f32 %v1254_v10, 0.0 }
  0xf0   : > { %v1289_v19 = vmax.f32 %v1225_v13, 0.0  ;;  %v1321_v20 = vmax.f32 %v1257_v14, 0.0  ;;  %v1223_v21 = vadd.f32 %v2625_v38, %v780_v17  ;;  %v1255_v22 = vadd.f32 %v2625_v38, %v908_v18 }
  0xf1   : > { %v2239_v25 = vpop.f32.mrf.mxu0  ;;  %v2271_v26 = vpop.f32.mrf.mxu1 }
  0xf2   : > { %v2018_v27 = vpack.c.bf16 %v1289_v19, %v1288_v15  ;;  %v2098_v28 = vpack.c.bf16 %v1321_v20, %v1320_v16  ;;  %v1287_v29 = vmax.f32 %v1223_v21, 0.0  ;;  %v1319_v30 = vmax.f32 %v1255_v22, 0.0 }
  0xf3   : > { %v1228_v31 = vadd.f32 %v2239_v25, %v2625_v38  ;;  %v1260_v32 = vadd.f32 %v2271_v26, %v2625_v38  ;;  %v793_v33 = vpop.f32.mrf.mxu0  ;;  %v921_v34 = vpop.f32.mrf.mxu1 }
  0xf4   : > { %2162 = vst [vmem:[%s2640_s18 + $0x18] sm:$0xff] %v2018_v27   ;;  %2178 = vst [vmem:[%s2640_s18 + $0x98] sm:$0xff] %v2098_v28   ;;  %v2013_v35 = vpack.c.bf16 %v1287_v29, %v1286_v23  ;;  %v2093_v36 = vpack.c.bf16 %v1319_v30, %v1318_v24  ;;  %v1226_v37 = vadd.f32 %v2625_v38, %v793_v33 }
  0xf5   : > { %v1258_v39 = vadd.f32 %v2625_v38, %v921_v34  ;;  %v2240_v40 = vpop.f32.mrf.mxu0  ;;  %v2272_v41 = vpop.f32.mrf.mxu1  ;;  %v1292_v44 = vmax.f32 %v1228_v31, 0.0  ;;  %v1324_v45 = vmax.f32 %v1260_v32, 0.0 }
  0xf6   : > { %2161 = vst [vmem:[%s2640_s18 + $0x10] sm:$0xff] %v2013_v35   ;;  %2177 = vst [vmem:[%s2640_s18 + $0x90] sm:$0xff] %v2093_v36   ;;  %v1229_v42 = vadd.f32 %v2240_v40, %v2625_v38  ;;  %v1261_v43 = vadd.f32 %v2272_v41, %v2625_v38  ;;  %v1290_v52 = vmax.f32 %v1226_v37, 0.0 }
  0xf7   : > { %v796_v46 = vpop.f32.mrf.mxu0  ;;  %v924_v47 = vpop.f32.mrf.mxu1  ;;  %v1322_v53 = vmax.f32 %v1258_v39, 0.0 }
  0xf8   : > { %v1293_v48 = vmax.f32 %v1229_v42, 0.0  ;;  %v1325_v49 = vmax.f32 %v1261_v43, 0.0  ;;  %v1227_v50 = vadd.f32 %v2625_v38, %v796_v46  ;;  %v1259_v51 = vadd.f32 %v2625_v38, %v924_v47 }
  0xf9   : > { %v2243_v54 = vpop.f32.mrf.mxu0  ;;  %v2275_v55 = vpop.f32.mrf.mxu1 }
  0xfa   : > { %v2028_v56 = vpack.c.bf16 %v1293_v48, %v1292_v44  ;;  %v2108_v57 = vpack.c.bf16 %v1325_v49, %v1324_v45  ;;  %v1291_v58 = vmax.f32 %v1227_v50, 0.0  ;;  %v1323_v59 = vmax.f32 %v1259_v51, 0.0 }
  0xfb   : > { %v1232_v60 = vadd.f32 %v2243_v54, %v2625_v38  ;;  %v1264_v61 = vadd.f32 %v2275_v55, %v2625_v38  ;;  %v809_v62 = vpop.f32.mrf.mxu0  ;;  %v937_v63 = vpop.f32.mrf.mxu1 }
  0xfc   : > { %2164 = vst [vmem:[%s2640_s18 + $0x28] sm:$0xff] %v2028_v56   ;;  %2180 = vst [vmem:[%s2640_s18 + $0xa8] sm:$0xff] %v2108_v57   ;;  %v2023_v0 = vpack.c.bf16 %v1291_v58, %v1290_v52  ;;  %v2103_v1 = vpack.c.bf16 %v1323_v59, %v1322_v53  ;;  %v1230_v2 = vadd.f32 %v2625_v38, %v809_v62 }
  0xfd   : > { %v1262_v3 = vadd.f32 %v2625_v38, %v937_v63  ;;  %v2244_v4 = vpop.f32.mrf.mxu0  ;;  %v2276_v5 = vpop.f32.mrf.mxu1  ;;  %v1296_v8 = vmax.f32 %v1232_v60, 0.0  ;;  %v1328_v9 = vmax.f32 %v1264_v61, 0.0 }
  0xfe   : > { %2163 = vst [vmem:[%s2640_s18 + $0x20] sm:$0xff] %v2023_v0   ;;  %2179 = vst [vmem:[%s2640_s18 + $0xa0] sm:$0xff] %v2103_v1   ;;  %v1233_v6 = vadd.f32 %v2244_v4, %v2625_v38  ;;  %v1265_v7 = vadd.f32 %v2276_v5, %v2625_v38  ;;  %v1294_v16 = vmax.f32 %v1230_v2, 0.0 }
  0xff   : > { %v812_v10 = vpop.f32.mrf.mxu0  ;;  %v940_v11 = vpop.f32.mrf.mxu1  ;;  %v1326_v17 = vmax.f32 %v1262_v3, 0.0 }
 0x100   : > { %v1297_v12 = vmax.f32 %v1233_v6, 0.0  ;;  %v1329_v13 = vmax.f32 %v1265_v7, 0.0  ;;  %v1231_v14 = vadd.f32 %v2625_v38, %v812_v10  ;;  %v1263_v15 = vadd.f32 %v2625_v38, %v940_v11 }
 0x101   : > { %v2247_v18 = vpop.f32.mrf.mxu0  ;;  %v2279_v19 = vpop.f32.mrf.mxu1 }
 0x102   : > { %v2038_v20 = vpack.c.bf16 %v1297_v12, %v1296_v8  ;;  %v2118_v21 = vpack.c.bf16 %v1329_v13, %v1328_v9  ;;  %v1295_v22 = vmax.f32 %v1231_v14, 0.0  ;;  %v1327_v23 = vmax.f32 %v1263_v15, 0.0 }
 0x103   : > { %v1236_v24 = vadd.f32 %v2247_v18, %v2625_v38  ;;  %v1268_v25 = vadd.f32 %v2279_v19, %v2625_v38  ;;  %v825_v26 = vpop.f32.mrf.mxu0  ;;  %v953_v27 = vpop.f32.mrf.mxu1 }
 0x104   : > { %2166 = vst [vmem:[%s2640_s18 + $0x38] sm:$0xff] %v2038_v20   ;;  %2182 = vst [vmem:[%s2640_s18 + $0xb8] sm:$0xff] %v2118_v21   ;;  %v2033_v28 = vpack.c.bf16 %v1295_v22, %v1294_v16  ;;  %v2113_v29 = vpack.c.bf16 %v1327_v23, %v1326_v17  ;;  %v1234_v30 = vadd.f32 %v2625_v38, %v825_v26 }
 0x105   : > { %v1266_v31 = vadd.f32 %v2625_v38, %v953_v27  ;;  %v2248_v32 = vpop.f32.mrf.mxu0  ;;  %v2280_v33 = vpop.f32.mrf.mxu1  ;;  %v1300_v36 = vmax.f32 %v1236_v24, 0.0  ;;  %v1332_v37 = vmax.f32 %v1268_v25, 0.0 }
 0x106   : > { %2165 = vst [vmem:[%s2640_s18 + $0x30] sm:$0xff] %v2033_v28   ;;  %2181 = vst [vmem:[%s2640_s18 + $0xb0] sm:$0xff] %v2113_v29   ;;  %v1237_v34 = vadd.f32 %v2248_v32, %v2625_v38  ;;  %v1269_v35 = vadd.f32 %v2280_v33, %v2625_v38  ;;  %v1298_v45 = vmax.f32 %v1234_v30, 0.0 }
 0x107   : > { %v828_v39 = vpop.f32.mrf.mxu0  ;;  %v956_v40 = vpop.f32.mrf.mxu1  ;;  %v1330_v46 = vmax.f32 %v1266_v31, 0.0 }
 0x108   : > { %v1301_v41 = vmax.f32 %v1237_v34, 0.0  ;;  %v1333_v42 = vmax.f32 %v1269_v35, 0.0  ;;  %v1235_v43 = vadd.f32 %v2625_v38, %v828_v39  ;;  %v1267_v44 = vadd.f32 %v2625_v38, %v956_v40 }
 0x109   : > { %v2251_v47 = vpop.f32.mrf.mxu0  ;;  %v2283_v48 = vpop.f32.mrf.mxu1 }
 0x10a   : > { %v2048_v49 = vpack.c.bf16 %v1301_v41, %v1300_v36  ;;  %v2128_v50 = vpack.c.bf16 %v1333_v42, %v1332_v37  ;;  %v1299_v51 = vmax.f32 %v1235_v43, 0.0  ;;  %v1331_v52 = vmax.f32 %v1267_v44, 0.0 }
 0x10b   : > { %v1240_v53 = vadd.f32 %v2251_v47, %v2625_v38  ;;  %v1272_v54 = vadd.f32 %v2283_v48, %v2625_v38  ;;  %v841_v55 = vpop.f32.mrf.mxu0  ;;  %v969_v56 = vpop.f32.mrf.mxu1 }
 0x10c   : > { %2168 = vst [vmem:[%s2640_s18 + $0x48] sm:$0xff] %v2048_v49   ;;  %2184 = vst [vmem:[%s2640_s18 + $0xc8] sm:$0xff] %v2128_v50   ;;  %v2043_v57 = vpack.c.bf16 %v1299_v51, %v1298_v45  ;;  %v2123_v58 = vpack.c.bf16 %v1331_v52, %v1330_v46  ;;  %v1238_v59 = vadd.f32 %v2625_v38, %v841_v55 }
 0x10d   : > { %v1270_v60 = vadd.f32 %v2625_v38, %v969_v56  ;;  %v2252_v61 = vpop.f32.mrf.mxu0  ;;  %v2284_v62 = vpop.f32.mrf.mxu1  ;;  %v1304_v1 = vmax.f32 %v1240_v53, 0.0  ;;  %v1336_v2 = vmax.f32 %v1272_v54, 0.0 }
 0x10e   : > { %2167 = vst [vmem:[%s2640_s18 + $0x40] sm:$0xff] %v2043_v57   ;;  %2183 = vst [vmem:[%s2640_s18 + $0xc0] sm:$0xff] %v2123_v58   ;;  %v1241_v63 = vadd.f32 %v2252_v61, %v2625_v38  ;;  %v1273_v0 = vadd.f32 %v2284_v62, %v2625_v38  ;;  %v1302_v9 = vmax.f32 %v1238_v59, 0.0 }
 0x10f   : > { %v844_v3 = vpop.f32.mrf.mxu0  ;;  %v972_v4 = vpop.f32.mrf.mxu1  ;;  %v1334_v10 = vmax.f32 %v1270_v60, 0.0 }
 0x110   : > { %v1305_v5 = vmax.f32 %v1241_v63, 0.0  ;;  %v1337_v6 = vmax.f32 %v1273_v0, 0.0  ;;  %v1239_v7 = vadd.f32 %v2625_v38, %v844_v3  ;;  %v1271_v8 = vadd.f32 %v2625_v38, %v972_v4 }
 0x111   : > { %v2255_v11 = vpop.f32.mrf.mxu0  ;;  %v2287_v12 = vpop.f32.mrf.mxu1 }
 0x112   : > { %v2058_v13 = vpack.c.bf16 %v1305_v5, %v1304_v1  ;;  %v2138_v14 = vpack.c.bf16 %v1337_v6, %v1336_v2  ;;  %v1303_v15 = vmax.f32 %v1239_v7, 0.0  ;;  %v1335_v16 = vmax.f32 %v1271_v8, 0.0 }
 0x113   : > { %v1244_v17 = vadd.f32 %v2255_v11, %v2625_v38  ;;  %v1276_v18 = vadd.f32 %v2287_v12, %v2625_v38  ;;  %v857_v19 = vpop.f32.mrf.mxu0  ;;  %v985_v20 = vpop.f32.mrf.mxu1 }
 0x114   : > { %2170 = vst [vmem:[%s2640_s18 + $0x58] sm:$0xff] %v2058_v13   ;;  %2186 = vst [vmem:[%s2640_s18 + $0xd8] sm:$0xff] %v2138_v14   ;;  %v2053_v21 = vpack.c.bf16 %v1303_v15, %v1302_v9  ;;  %v2133_v22 = vpack.c.bf16 %v1335_v16, %v1334_v10  ;;  %v1242_v23 = vadd.f32 %v2625_v38, %v857_v19 }
 0x115   : > { %v1274_v24 = vadd.f32 %v2625_v38, %v985_v20  ;;  %v2256_v25 = vpop.f32.mrf.mxu0  ;;  %v2288_v26 = vpop.f32.mrf.mxu1  ;;  %v1308_v29 = vmax.f32 %v1244_v17, 0.0  ;;  %v1340_v30 = vmax.f32 %v1276_v18, 0.0 }
 0x116   : > { %2169 = vst [vmem:[%s2640_s18 + $0x50] sm:$0xff] %v2053_v21   ;;  %2185 = vst [vmem:[%s2640_s18 + $0xd0] sm:$0xff] %v2133_v22   ;;  %v1245_v27 = vadd.f32 %v2256_v25, %v2625_v38  ;;  %v1277_v28 = vadd.f32 %v2288_v26, %v2625_v38  ;;  %v1306_v37 = vmax.f32 %v1242_v23, 0.0 }
 0x117   : > { %v860_v31 = vpop.f32.mrf.mxu0  ;;  %v988_v32 = vpop.f32.mrf.mxu1  ;;  %v1338_v39 = vmax.f32 %v1274_v24, 0.0 }
 0x118   : > { %v1309_v33 = vmax.f32 %v1245_v27, 0.0  ;;  %v1341_v34 = vmax.f32 %v1277_v28, 0.0  ;;  %v1243_v35 = vadd.f32 %v2625_v38, %v860_v31  ;;  %v1275_v36 = vadd.f32 %v2625_v38, %v988_v32 }
 0x119   : > { %v2259_v40 = vpop.f32.mrf.mxu0  ;;  %v2291_v41 = vpop.f32.mrf.mxu1 }
 0x11a   : > { %v2068_v42 = vpack.c.bf16 %v1309_v33, %v1308_v29  ;;  %v2148_v43 = vpack.c.bf16 %v1341_v34, %v1340_v30  ;;  %v1307_v44 = vmax.f32 %v1243_v35, 0.0  ;;  %v1339_v45 = vmax.f32 %v1275_v36, 0.0 }
 0x11b   : > { %v1248_v46 = vadd.f32 %v2259_v40, %v2625_v38  ;;  %v1280_v47 = vadd.f32 %v2291_v41, %v2625_v38  ;;  %v873_v48 = vpop.f32.mrf.mxu0  ;;  %v1001_v49 = vpop.f32.mrf.mxu1 }
 0x11c   : > { %2172 = vst [vmem:[%s2640_s18 + $0x68] sm:$0xff] %v2068_v42   ;;  %2188 = vst [vmem:[%s2640_s18 + $0xe8] sm:$0xff] %v2148_v43   ;;  %v2063_v50 = vpack.c.bf16 %v1307_v44, %v1306_v37  ;;  %v2143_v51 = vpack.c.bf16 %v1339_v45, %v1338_v39  ;;  %v1246_v52 = vadd.f32 %v2625_v38, %v873_v48 }
 0x11d   : > { %v1278_v53 = vadd.f32 %v2625_v38, %v1001_v49  ;;  %v2260_v54 = vpop.f32.mrf.mxu0  ;;  %v2292_v55 = vpop.f32.mrf.mxu1  ;;  %v1312_v58 = vmax.f32 %v1248_v46, 0.0  ;;  %v1344_v59 = vmax.f32 %v1280_v47, 0.0 }
 0x11e   : > { %2171 = vst [vmem:[%s2640_s18 + $0x60] sm:$0xff] %v2063_v50   ;;  %2187 = vst [vmem:[%s2640_s18 + $0xe0] sm:$0xff] %v2143_v51   ;;  %v1249_v56 = vadd.f32 %v2260_v54, %v2625_v38  ;;  %v1281_v57 = vadd.f32 %v2292_v55, %v2625_v38  ;;  %v1310_v2 = vmax.f32 %v1246_v52, 0.0 }
 0x11f   : > { %v876_v60 = vpop.f32.mrf.mxu0  ;;  %v1004_v61 = vpop.f32.mrf.mxu1  ;;  %v1342_v3 = vmax.f32 %v1278_v53, 0.0 }
 0x120   : > { %v1313_v62 = vmax.f32 %v1249_v56, 0.0  ;;  %v1345_v63 = vmax.f32 %v1281_v57, 0.0  ;;  %v1247_v0 = vadd.f32 %v2625_v38, %v876_v60  ;;  %v1279_v1 = vadd.f32 %v2625_v38, %v1004_v61 }
 0x122   : > { %v2078_v4 = vpack.c.bf16 %v1313_v62, %v1312_v58  ;;  %v2158_v5 = vpack.c.bf16 %v1345_v63, %v1344_v59  ;;  %v1311_v6 = vmax.f32 %v1247_v0, 0.0  ;;  %v1343_v7 = vmax.f32 %v1279_v1, 0.0 }
 0x124   : > { %2174 = vst [vmem:[%s2640_s18 + $0x78] sm:$0xff] %v2078_v4   ;;  %2190 = vst [vmem:[%s2640_s18 + $0xf8] sm:$0xff] %v2158_v5   ;;  %v2073_v38 = vpack.c.bf16 %v1311_v6, %v1310_v2  ;;  %v2153_v8 = vpack.c.bf16 %v1343_v7, %v1342_v3 }
 0x126   : > { %2173 = vst [vmem:[%s2640_s18 + $0x70] sm:$0xff] %v2073_v38   ;;  %2189 = vst [vmem:[%s2640_s18 + $0xf0] sm:$0xff] %v2153_v8  }
 0x127   : > { %2402 = shalt.err (!%p2399_p5)
}
 0x128   : > { %s2403_s5 = scalar_lea.hbm %s2729_s27, 4096  ;;  %s2407_s8 = scalar_lea.hbm %s2787_s3, 16384 }
 0x129   : > { %p2404_p6 = scmp.ne.s32.totalorder %s2729_s27, %s2403_s5  ;;  %p2408_p10 = scmp.lt.s32.totalorder %s2729_s27, %s2787_s3 }
 0x12a   : > { %p2409_p11 = scmp.lt.s32.totalorder %s2407_s8, %s2403_s5 }
 0x12b   : > { %p2405_p7 = pnand %p2404_p6, %p2531_p4 }
 0x12c   : > { %p2410_p12 = por %p2409_p11, %p2408_p10 }
 0x12d   : > { %p2406_p9 = pneg %p2405_p7 }
 0x12f   : > { %p2411_p13 = pnand %p2410_p12, %p2406_p9 }
 0x131   : > { %2414 = shalt.err (!%p2411_p13)
}
 0x132   : > { %s2469_s11 = smov 64   ;;  %s2470_s18 = smov 4  }
 0x133   : > { %2297 = dma.vmem_to_hbm [thread:$0]  (%p2531_p4), %s2731_s21, 4096, %s2729_s27, %s2739_s15, %s2469_s11, %s2469_s11, %s2470_s18  }
 0x134 PF: > { %p2303_p0 = scmp.ge.s32.totalorder %s2465_s17, 2  ;;  %s1696_s19 = sand.u32 1, %s2445_s12  }
 0x135   : > { %s1697_s23 = scalar_lea.sflag [#allocation4], %s1696_s19 }
 0x136   : > { %p2300_p1 = pnand %p2303_p0, %p2538_p8 }
 0x138   : > { %p2301_p2 = pneg %p2300_p1 }
 0x13a   : > { %2440 = dma.done.wait (%p2301_p2), %s1697_s23, 4096  }
 0x13b   : > { %2442 = vsyncadd (%p2301_p2), %s1697_s23, 4294963200  ;;  %s16_s17 = sadd.s32 1, %s2465_s17   ;;  %s2790_s12 = smov %s2449_s13 }
 0x13c   : > { %p13_p3 = scmp.ge.s32.totalorder %s16_s17, 6   ;;  %s2791_s13 = smov %s2453_s14 }
 0x13d   : > { %s2792_s14 = smov %s2544_s25  ;;  %s2793_s15 = smov %s2461_s16 }
 0x13e   : > { %s2794_s16 = smov %s2796_s20  ;;  %15 = sbr.rel (!%p13_p3) target bundleno = 4 (0x4), region = 81 }
 0x143   :  { %1702 = vsyncpa [#allocation4], 1 }
 0x144   :  { %1704 = vsyncpa [#allocation4 + $0x1], 1 }

</bundles_post_ra>
